<compile_context>
chip_gen: v5e
topology: v5e:2x2
jax: 0.10.0
libtpu: 0.0.40
codegen_flags: <defaults>
</compile_context>

<pallas_src>
import functools

import jax
import jax.numpy as jnp
from jax.experimental import pallas as pl
from jax.experimental.pallas import tpu as pltpu

INPUT_SIZE = 128
HIDDEN = 100
N_CLASS = 10
BN_EPS = 1e-5

F_PAD = 128       # all feature dims padded to the 128-lane width
TB_MAX = 1024     # rows per grid step for large batches


# ---------------------------------------------------------------------------
# Kernel: one batch tile through fc1(+bn1)+relu -> fc2(+bn2)+relu -> fc3
# ---------------------------------------------------------------------------
def _classnet_kernel(x_ref, w_ref, b_ref, o_ref):
    # x_ref: [TB, 128] (compute dtype)   w_ref: [3, 128, 128] (compute dtype)
    # b_ref: [3, 1, 128] f32             o_ref: [TB, 128] f32
    cdt = w_ref.dtype

    # fc1 (BN1 folded into weights/bias) -> relu
    h = jnp.dot(x_ref[...], w_ref[0], preferred_element_type=jnp.float32) + b_ref[0]
    h = jnp.maximum(h, 0.0)
    # TODO(synk): training-mode Dropout(p=0.5) would need pltpu.prng_* masking; eval mode = identity.

    # fc2 (BN2 folded) -> relu
    h = jnp.dot(h.astype(cdt), w_ref[1], preferred_element_type=jnp.float32) + b_ref[1]
    h = jnp.maximum(h, 0.0)

    # fc3
    out = jnp.dot(h.astype(cdt), w_ref[2], preferred_element_type=jnp.float32) + b_ref[2]
    o_ref[...] = out.astype(o_ref.dtype)


# ---------------------------------------------------------------------------
# One-time parameter preparation (hoisted out of the inference path)
# ---------------------------------------------------------------------------
def prepare_params(params, compute_dtype=jnp.bfloat16):
    """Fold BN into the linears, transpose to [in,out], zero-pad to 128, pack."""

    def bn_fold(gamma, beta, mean, var):
        scale = gamma / jnp.sqrt(var + BN_EPS)
        shift = beta - mean * scale
        return scale, shift

    s1, t1 = bn_fold(params["bn1_gamma"], params["bn1_beta"],
                     params["bn1_mean"], params["bn1_var"])
    s2, t2 = bn_fold(params["bn2_gamma"], params["bn2_beta"],
                     params["bn2_mean"], params["bn2_var"])

    # PyTorch weights are [out, in]; use [in, out] so the kernel does x @ W.
    # Fold the BN scale into each output column, shift into the bias (f32 fold).
    w1 = params["fc1_w"].T.astype(jnp.float32) * s1[None, :]
    b1 = params["fc1_b"] * s1 + t1
    w2 = params["fc2_w"].T.astype(jnp.float32) * s2[None, :]
    b2 = params["fc2_b"] * s2 + t2
    w3 = params["fc3_w"].T.astype(jnp.float32)
    b3 = params["fc3_b"]

    def pad_w(w):
        out = jnp.zeros((F_PAD, F_PAD), jnp.float32)
        return out.at[: w.shape[0], : w.shape[1]].set(w)

    def pad_b(b):
        out = jnp.zeros((F_PAD,), jnp.float32)
        return out.at[: b.shape[0]].set(b)

    # Padded channels get zero weight column + zero bias -> stay exactly 0 through relu.
    w_packed = jnp.stack([pad_w(w1), pad_w(w2), pad_w(w3)]).astype(compute_dtype)
    b_packed = jnp.stack([pad_b(b1), pad_b(b2), pad_b(b3)])[:, None, :]  # [3,1,128] f32
    return {"w": w_packed, "b": b_packed}


# ---------------------------------------------------------------------------
# Jitted inference wrapper
# ---------------------------------------------------------------------------
@functools.partial(jax.jit, static_argnames=("n_class",))
def classnet_small_image(x, packed, n_class=N_CLASS):
    """x: [B, input_size(<=128)] -> logits [B, n_class] (float32)."""
    w = packed["w"]            # [3, 128, 128] compute dtype
    b = packed["b"]            # [3, 1, 128] f32
    cdt = w.dtype
    sub = 8 if cdt == jnp.float32 else 16   # sublane packing: f32=8, bf16=16

    B, F = x.shape
    if F < F_PAD:
        x = jnp.pad(x, ((0, 0), (0, F_PAD - F)))
    x = x.astype(cdt)

    # Row padding only (no extra full copy of x when B is already aligned).
    Bp = max(sub, -(-B // sub) * sub)
    if Bp <= TB_MAX:
        tb = Bp                                # small batch: single tile
    else:
        tb = TB_MAX                            # large batch: pipeline over row tiles
        Bp = -(-Bp // tb) * tb
    if Bp != B:
        x = jnp.pad(x, ((0, Bp - B), (0, 0)))

    out = pl.pallas_call(
        _classnet_kernel,
        out_shape=jax.ShapeDtypeStruct((Bp, F_PAD), jnp.float32),
        grid=(Bp // tb,),
        in_specs=[
            pl.BlockSpec((tb, F_PAD), lambda i: (i, 0)),          # batch-tiled x
            pl.BlockSpec((3, F_PAD, F_PAD), lambda i: (0, 0, 0)),  # resident weights
            pl.BlockSpec((3, 1, F_PAD), lambda i: (0, 0, 0)),      # resident biases
        ],
        out_specs=pl.BlockSpec((tb, F_PAD), lambda i: (i, 0)),
        compiler_params=pltpu.CompilerParams(
            dimension_semantics=("parallel",)),                    # megacore on v7x
    )(x, w, b)

    return out[:B, :n_class]


# ---------------------------------------------------------------------------
# Synthetic params + pure-JAX reference
# ---------------------------------------------------------------------------
def init_params(key, input_size=INPUT_SIZE, n_class=N_CLASS):
    ks = jax.random.split(key, 10)

    def linear(kw, kb, out_f, in_f):
        bound = 1.0 / jnp.sqrt(in_f)
        w = jax.random.uniform(kw, (out_f, in_f), jnp.float32, -bound, bound)
        b = jax.random.uniform(kb, (out_f,), jnp.float32, -bound, bound)
        return w, b

    fc1_w, fc1_b = linear(ks[0], ks[1], HIDDEN, input_size)
    fc2_w, fc2_b = linear(ks[2], ks[3], HIDDEN, HIDDEN)
    fc3_w, fc3_b = linear(ks[4], ks[5], n_class, HIDDEN)

    bn1_mean = 0.05 * jax.random.normal(ks[6], (HIDDEN,), jnp.float32)
    bn1_var = jnp.abs(1.0 + 0.1 * jax.random.normal(ks[7], (HIDDEN,), jnp.float32))
    bn2_mean = 0.05 * jax.random.normal(ks[8], (HIDDEN,), jnp.float32)
    bn2_var = jnp.abs(1.0 + 0.1 * jax.random.normal(ks[9], (HIDDEN,), jnp.float32))

    return dict(
        fc1_w=fc1_w, fc1_b=fc1_b,
        bn1_gamma=jnp.ones((HIDDEN,), jnp.float32),
        bn1_beta=jnp.zeros((HIDDEN,), jnp.float32),
        bn1_mean=bn1_mean, bn1_var=bn1_var,
        fc2_w=fc2_w, fc2_b=fc2_b,
        bn2_gamma=jnp.ones((HIDDEN,), jnp.float32),
        bn2_beta=jnp.zeros((HIDDEN,), jnp.float32),
        bn2_mean=bn2_mean, bn2_var=bn2_var,
        fc3_w=fc3_w, fc3_b=fc3_b,
    )


def _reference(x, p):
    h = x @ p["fc1_w"].T + p["fc1_b"]
    h = (h - p["bn1_mean"]) / jnp.sqrt(p["bn1_var"] + BN_EPS) * p["bn1_gamma"] + p["bn1_beta"]
    h = jnp.maximum(h, 0.0)
    h = h @ p["fc2_w"].T + p["fc2_b"]
    h = (h - p["bn2_mean"]) / jnp.sqrt(p["bn2_var"] + BN_EPS) * p["bn2_gamma"] + p["bn2_beta"]
    h = jnp.maximum(h, 0.0)
    return h @ p["fc3_w"].T + p["fc3_b"]


if __name__ == "__main__":
    key = jax.random.PRNGKey(0)
    kx, kp = jax.random.split(key)

    B = 2
    x = jax.random.normal(kx, (B, INPUT_SIZE), jnp.float32)
    params = init_params(kp)
    ref = _reference(x, params)

    # f32 path: exact validation of kernel / BN folding / padding.
    packed_f32 = prepare_params(params, compute_dtype=jnp.float32)
    out_f32 = jax.block_until_ready(classnet_small_image(x, packed_f32))
    assert out_f32.shape == (B, N_CLASS), out_f32.shape
    assert jnp.allclose(out_f32, ref, atol=1e-4, rtol=1e-4), float(jnp.max(jnp.abs(out_f32 - ref)))

    # bf16 path (default fast path on v6e/v7x): f32 accumulation, loose tolerance.
    packed_bf16 = prepare_params(params, compute_dtype=jnp.bfloat16)
    out_bf16 = jax.block_until_ready(classnet_small_image(x, packed_bf16))
    assert out_bf16.shape == (B, N_CLASS), out_bf16.shape
    assert jnp.allclose(out_bf16, ref, atol=5e-2, rtol=5e-2), float(jnp.max(jnp.abs(out_bf16 - ref)))

    print("KERNEL_OK")
</pallas_src>

<mosaic_0001>
module attributes {stable_mosaic.version = 11 : i64} {
  func.func @_classnet_kernel(%arg0: i32, %arg1: memref<8x128xf32, #tpu.memory_space<vmem>>, %arg2: memref<3x128x128xf32, #tpu.memory_space<vmem>>, %arg3: memref<3x1x128xf32, #tpu.memory_space<vmem>>, %arg4: memref<8x128xf32, #tpu.memory_space<vmem>>) attributes {dimension_semantics = [#tpu.dimension_semantics<parallel>], iteration_bounds = array<i64: 1>, scalar_prefetch = 0 : i64, scratch_operands = 0 : i64, tpu.core_type = #tpu.core_type<tc>, window_params = [{transform_indices = @transform_0, window_bounds = array<i64: 8, 128>}, {pipeline_mode = #tpu.pipeline_mode<synchronous>, transform_indices = @transform_1, window_bounds = array<i64: 3, 128, 128>}, {pipeline_mode = #tpu.pipeline_mode<synchronous>, transform_indices = @transform_2, window_bounds = array<i64: 3, 1, 128>}, {transform_indices = @transform_3, window_bounds = array<i64: 8, 128>}]} {
    %c0 = arith.constant 0 : index
    %c0_0 = arith.constant 0 : index
    %0 = vector.load %arg1[%c0, %c0_0] : memref<8x128xf32, #tpu.memory_space<vmem>>, vector<8x128xf32>
    %c0_1 = arith.constant 0 : index
    %c0_2 = arith.constant 0 : index
    %c0_3 = arith.constant 0 : index
    %1 = vector.load %arg2[%c0_1, %c0_2, %c0_3] : memref<3x128x128xf32, #tpu.memory_space<vmem>>, vector<1x128x128xf32>
    %2 = vector.shape_cast %1 : vector<1x128x128xf32> to vector<128x128xf32>
    %cst = arith.constant dense<0.000000e+00> : vector<8x128xf32>
    %3 = tpu.matmul %0, %2, %cst {dimension_numbers = #tpu.dot_dimension_numbers<[1], [0], [0], [1], [0, 0, 1, 1], [], []>} : vector<8x128xf32>, vector<128x128xf32>, vector<8x128xf32> -> vector<8x128xf32>
    %c0_4 = arith.constant 0 : index
    %c0_5 = arith.constant 0 : index
    %c0_6 = arith.constant 0 : index
    %4 = vector.load %arg3[%c0_4, %c0_5, %c0_6] : memref<3x1x128xf32, #tpu.memory_space<vmem>>, vector<1x1x128xf32>
    %5 = vector.shape_cast %4 : vector<1x1x128xf32> to vector<1x128xf32>
    %6 = vector.broadcast %5 : vector<1x128xf32> to vector<8x128xf32>
    %7 = arith.addf %3, %6 : vector<8x128xf32>
    %cst_7 = arith.constant 0.000000e+00 : f32
    %8 = vector.broadcast %cst_7 : f32 to vector<8x128xf32>
    %9 = arith.maximumf %7, %8 : vector<8x128xf32>
    %c1 = arith.constant 1 : index
    %c0_8 = arith.constant 0 : index
    %c0_9 = arith.constant 0 : index
    %10 = vector.load %arg2[%c1, %c0_8, %c0_9] : memref<3x128x128xf32, #tpu.memory_space<vmem>>, vector<1x128x128xf32>
    %11 = vector.shape_cast %10 : vector<1x128x128xf32> to vector<128x128xf32>
    %cst_10 = arith.constant dense<0.000000e+00> : vector<8x128xf32>
    %12 = tpu.matmul %9, %11, %cst_10 {dimension_numbers = #tpu.dot_dimension_numbers<[1], [0], [0], [1], [0, 0, 1, 1], [], []>} : vector<8x128xf32>, vector<128x128xf32>, vector<8x128xf32> -> vector<8x128xf32>
    %c1_11 = arith.constant 1 : index
    %c0_12 = arith.constant 0 : index
    %c0_13 = arith.constant 0 : index
    %13 = vector.load %arg3[%c1_11, %c0_12, %c0_13] : memref<3x1x128xf32, #tpu.memory_space<vmem>>, vector<1x1x128xf32>
    %14 = vector.shape_cast %13 : vector<1x1x128xf32> to vector<1x128xf32>
    %15 = vector.broadcast %14 : vector<1x128xf32> to vector<8x128xf32>
    %16 = arith.addf %12, %15 : vector<8x128xf32>
    %cst_14 = arith.constant 0.000000e+00 : f32
    %17 = vector.broadcast %cst_14 : f32 to vector<8x128xf32>
    %18 = arith.maximumf %16, %17 : vector<8x128xf32>
    %c2 = arith.constant 2 : index
    %c0_15 = arith.constant 0 : index
    %c0_16 = arith.constant 0 : index
    %19 = vector.load %arg2[%c2, %c0_15, %c0_16] : memref<3x128x128xf32, #tpu.memory_space<vmem>>, vector<1x128x128xf32>
    %20 = vector.shape_cast %19 : vector<1x128x128xf32> to vector<128x128xf32>
    %cst_17 = arith.constant dense<0.000000e+00> : vector<8x128xf32>
    %21 = tpu.matmul %18, %20, %cst_17 {dimension_numbers = #tpu.dot_dimension_numbers<[1], [0], [0], [1], [0, 0, 1, 1], [], []>} : vector<8x128xf32>, vector<128x128xf32>, vector<8x128xf32> -> vector<8x128xf32>
    %c2_18 = arith.constant 2 : index
    %c0_19 = arith.constant 0 : index
    %c0_20 = arith.constant 0 : index
    %22 = vector.load %arg3[%c2_18, %c0_19, %c0_20] : memref<3x1x128xf32, #tpu.memory_space<vmem>>, vector<1x1x128xf32>
    %23 = vector.shape_cast %22 : vector<1x1x128xf32> to vector<1x128xf32>
    %24 = vector.broadcast %23 : vector<1x128xf32> to vector<8x128xf32>
    %25 = arith.addf %21, %24 : vector<8x128xf32>
    %c0_21 = arith.constant 0 : index
    %c0_22 = arith.constant 0 : index
    %26 = vector.load %arg4[%c0_21, %c0_22] : memref<8x128xf32, #tpu.memory_space<vmem>>, vector<8x128xf32>
    tpu.vector_store %arg4[%c0_21, %c0_22], %25 {strides = array<i32>} : memref<8x128xf32, #tpu.memory_space<vmem>>, vector<8x128xf32>,
    return
  }
  func.func @transform_0(%arg0: i32) -> (i32, i32) {
    %c0_i32 = arith.constant 0 : i32
    %c0_i32_0 = arith.constant 0 : i32
    return %arg0, %c0_i32 : i32, i32
  }
  func.func @transform_1(%arg0: i32) -> (i32, i32, i32) {
    %c0_i32 = arith.constant 0 : i32
    %c0_i32_0 = arith.constant 0 : i32
    %c0_i32_1 = arith.constant 0 : i32
    %c0_i32_2 = arith.constant 0 : i32
    return %c0_i32, %c0_i32_0, %c0_i32_1 : i32, i32, i32
  }
  func.func @transform_2(%arg0: i32) -> (i32, i32, i32) {
    %c0_i32 = arith.constant 0 : i32
    %c0_i32_0 = arith.constant 0 : i32
    %c0_i32_1 = arith.constant 0 : i32
    %c0_i32_2 = arith.constant 0 : i32
    return %c0_i32, %c0_i32_0, %c0_i32_1 : i32, i32, i32
  }
  func.func @transform_3(%arg0: i32) -> (i32, i32) {
    %c0_i32 = arith.constant 0 : i32
    %c0_i32_0 = arith.constant 0 : i32
    return %arg0, %c0_i32 : i32, i32
  }
}

</mosaic_0001>

<bundles_post_ra>
// kernel: classnet_small_image.1
= control target key start
LH: loop header
LB: loop body
LE: loop exit
PB: predicated region body
PF: predicated region fallthrough
CT: control target
= control target key end

     0   :  { %8 = vsyncpa [#allocation3], 0  ;;  %s197_s15 = smov [#allocation2]   ;;  %s198_s17 = smov 128   ;;  %s238_s0 = inlined_call_operand.vmem [shape: f32[8,128], index: 0, kind: input, shape index: {}]   ;;  %s239_s1 = inlined_call_operand.hbm [shape: f32[3,128,128], index: 1, kind: input, shape index: {}]   ;;  %s240_s2 = inlined_call_operand.vmem [shape: f32[3,1,128], index: 2, kind: input, shape index: {}]   ;;  %s241_s3 = inlined_call_operand.vmem [shape: f32[8,128], index: 3, kind: output, shape index: {}]  }
   0x1   :  { %s15_s14 = sshll.u32 %s239_s1, 4  ;;  %s17_s16 = sshll.u32 %s197_s15, 4  ;;  %s16_s14 = int_to_ptr.hbm [resolvable:$true] %s15_s14  ;;  %s18_s16 = int_to_ptr.vmem [resolvable:$true] %s17_s16 }
   0x2   :  { %s199_s18 = smov 8  }
   0x3   :  { %23 = dma.hbm_to_vmem [thread:$0]  %s16_s14, 6144, %s18_s16, [#allocation3], %s198_s17, %s198_s17, %s199_s18  }
   0x4   :  { %195 = dma.done.wait [#allocation3], 6144  }
   0x5   :  { %196 = vsyncadd [#allocation3], 4294961152  ;;  %v46_v0 = vld [vmem:[#allocation2 + $0x78] sm:$0xff]  ;;  %v45_v1 = vld [vmem:[#allocation2 + $0x70] sm:$0xff] }
   0x6   :  { %51 = vmatpush.msra.mxu0 %v46_v0  ;;  %v44_v2 = vld [vmem:[#allocation2 + $0x68] sm:$0xff]  ;;  %v43_v3 = vld [vmem:[#allocation2 + $0x60] sm:$0xff]  ;;  %v88_v4 = vld [vmem:[#allocation2 + $0xf8] sm:$0xff] }
   0x7   :  { %v42_v5 = vld [vmem:[#allocation2 + $0x58] sm:$0xff]  ;;  %94 = vmatpush.msra.mxu1 %v88_v4  ;;  %v87_v6 = vld [vmem:[#allocation2 + $0xf0] sm:$0xff]  ;;  %v86_v7 = vld [vmem:[#allocation2 + $0xe8] sm:$0xff] }
   0x8   :  { %52 = vmatpush.msra.mxu0 %v45_v1  ;;  %v41_v8 = vld [vmem:[#allocation2 + $0x50] sm:$0xff]  ;;  %v85_v9 = vld [vmem:[#allocation2 + $0xe0] sm:$0xff]  ;;  %v40_v10 = vld [vmem:[#allocation2 + $0x48] sm:$0xff] }
   0x9   :  { %95 = vmatpush.msra.mxu1 %v87_v6  ;;  %v84_v11 = vld [vmem:[#allocation2 + $0xd8] sm:$0xff]  ;;  %v39_v12 = vld [vmem:[#allocation2 + $0x40] sm:$0xff]  ;;  %v83_v13 = vld [vmem:[#allocation2 + $0xd0] sm:$0xff] }
   0xa   :  { %53 = vmatpush.msra.mxu0 %v44_v2  ;;  %v38_v14 = vld [vmem:[#allocation2 + $0x38] sm:$0xff]  ;;  %v82_v15 = vld [vmem:[#allocation2 + $0xc8] sm:$0xff]  ;;  %v37_v16 = vld [vmem:[#allocation2 + $0x30] sm:$0xff] }
   0xb   :  { %96 = vmatpush.msra.mxu1 %v86_v7  ;;  %v81_v17 = vld [vmem:[#allocation2 + $0xc0] sm:$0xff]  ;;  %v36_v18 = vld [vmem:[#allocation2 + $0x28] sm:$0xff]  ;;  %v80_v19 = vld [vmem:[#allocation2 + $0xb8] sm:$0xff] }
   0xc   :  { %54 = vmatpush.msra.mxu0 %v43_v3  ;;  %v35_v20 = vld [vmem:[#allocation2 + $0x20] sm:$0xff]  ;;  %v79_v21 = vld [vmem:[#allocation2 + $0xb0] sm:$0xff]  ;;  %v34_v22 = vld [vmem:[#allocation2 + $0x18] sm:$0xff] }
   0xd   :  { %97 = vmatpush.msra.mxu1 %v85_v9  ;;  %v78_v23 = vld [vmem:[#allocation2 + $0xa8] sm:$0xff]  ;;  %v33_v24 = vld [vmem:[#allocation2 + $0x10] sm:$0xff]  ;;  %v77_v25 = vld [vmem:[#allocation2 + $0xa0] sm:$0xff] }
   0xe   :  { %55 = vmatpush.msra.mxu0 %v42_v5  ;;  %v32_v26 = vld [vmem:[#allocation2 + $0x8] sm:$0xff]  ;;  %v76_v27 = vld [vmem:[#allocation2 + $0x98] sm:$0xff]  ;;  %v31_v28 = vld [vmem:[#allocation2] sm:$0xff] }
   0xf   :  { %98 = vmatpush.msra.mxu1 %v84_v11  ;;  %v30_v29 = vld [vmem:[%s238_s0] sm:$0xff]  ;;  %v75_v30 = vld [vmem:[#allocation2 + $0x90] sm:$0xff]  ;;  %v74_v31 = vld [vmem:[#allocation2 + $0x88] sm:$0xff] }
  0x10   :  { %56 = vmatpush.msra.mxu0 %v41_v8  ;;  %v73_v32 = vld [vmem:[#allocation2 + $0x80] sm:$0xff]  ;;  %v131_v33 = vld [vmem:[#allocation2 + $0x178] sm:$0xff]  ;;  %v130_v34 = vld [vmem:[#allocation2 + $0x170] sm:$0xff] }
  0x11   :  { %99 = vmatpush.msra.mxu1 %v83_v13  ;;  %137 = vmatpush.msra.mxu2 %v131_v33  ;;  %v129_v35 = vld [vmem:[#allocation2 + $0x168] sm:$0xff]  ;;  %v128_v36 = vld [vmem:[#allocation2 + $0x160] sm:$0xff]  ;;  %v127_v37 = vld [vmem:[#allocation2 + $0x158] sm:$0xff] }
  0x12   :  { %57 = vmatpush.msra.mxu0 %v40_v10  ;;  %v126_v38 = vld [vmem:[#allocation2 + $0x150] sm:$0xff]  ;;  %v125_v39 = vld [vmem:[#allocation2 + $0x148] sm:$0xff]  ;;  %v124_v40 = vld [vmem:[#allocation2 + $0x140] sm:$0xff] }
  0x13   :  { %100 = vmatpush.msra.mxu1 %v82_v15  ;;  %138 = vmatpush.msra.mxu2 %v130_v34  ;;  %v123_v41 = vld [vmem:[#allocation2 + $0x138] sm:$0xff]  ;;  %v122_v42 = vld [vmem:[#allocation2 + $0x130] sm:$0xff]  ;;  %v121_v43 = vld [vmem:[#allocation2 + $0x128] sm:$0xff] }
  0x14   :  { %58 = vmatpush.msra.mxu0 %v39_v12  ;;  %v120_v44 = vld [vmem:[#allocation2 + $0x120] sm:$0xff]  ;;  %v119_v45 = vld [vmem:[#allocation2 + $0x118] sm:$0xff]  ;;  %v118_v50 = vld [vmem:[#allocation2 + $0x110] sm:$0xff] }
  0x15   :  { %101 = vmatpush.msra.mxu1 %v81_v17  ;;  %139 = vmatpush.msra.mxu2 %v129_v35  ;;  %v168_v46 = vld [vmem:[%s240_s2] ss:$0 sm:$0xff]  ;;  %v117_v51 = vld [vmem:[#allocation2 + $0x108] sm:$0xff]  ;;  %v169_v53 = vld [vmem:[%s240_s2 + $0x1] ss:$0 sm:$0xff] }
  0x16   :  { %59 = vmatpush.msra.mxu0 %v38_v14  ;;  %v116_v52 = vld [vmem:[#allocation2 + $0x100] sm:$0xff] }
  0x17   :  { %102 = vmatpush.msra.mxu1 %v80_v19  ;;  %140 = vmatpush.msra.mxu2 %v128_v36  ;;  %v170_v57 = vld [vmem:[%s240_s2 + $0x2] ss:$0 sm:$0xff] }
  0x18   :  { %60 = vmatpush.msra.mxu0 %v37_v16 }
  0x19   :  { %103 = vmatpush.msra.mxu1 %v79_v21  ;;  %141 = vmatpush.msra.mxu2 %v127_v37 }
  0x1a   :  { %61 = vmatpush.msra.mxu0 %v36_v18 }
  0x1b   :  { %104 = vmatpush.msra.mxu1 %v78_v23  ;;  %142 = vmatpush.msra.mxu2 %v126_v38 }
  0x1c   :  { %62 = vmatpush.msra.mxu0 %v35_v20 }
  0x1d   :  { %105 = vmatpush.msra.mxu1 %v77_v25  ;;  %143 = vmatpush.msra.mxu2 %v125_v39 }
  0x1e   :  { %63 = vmatpush.msra.mxu0 %v34_v22 }
  0x1f   :  { %106 = vmatpush.msra.mxu1 %v76_v27  ;;  %144 = vmatpush.msra.mxu2 %v124_v40 }
  0x20   :  { %64 = vmatpush.msra.mxu0 %v33_v24 }
  0x21   :  { %107 = vmatpush.msra.mxu1 %v75_v30  ;;  %145 = vmatpush.msra.mxu2 %v123_v41 }
  0x22   :  { %65 = vmatpush.msra.mxu0 %v32_v26 }
  0x23   :  { %108 = vmatpush.msra.mxu1 %v74_v31  ;;  %146 = vmatpush.msra.mxu2 %v122_v42 }
  0x24   :  { %66 = vmatpush.msra.mxu0 %v31_v28 }
  0x25   :  { %67 = vmatmul.f32.vlgmr.msra.gmra.mxu0 %v30_v29  ;;  %109 = vmatpush.msra.mxu1 %v73_v32 }
  0x26   :  { %147 = vmatpush.msra.mxu2 %v121_v43 }
  0x28   :  { %148 = vmatpush.msra.mxu2 %v120_v44 }
  0x2a   :  { %149 = vmatpush.msra.mxu2 %v119_v45 }
  0x2c   :  { %150 = vmatpush.msra.mxu2 %v118_v50 }
  0x2e   :  { %151 = vmatpush.msra.mxu2 %v117_v51 }
  0x30   :  { %152 = vmatpush.msra.mxu2 %v116_v52 }
  0xa2   :  { %v68_v47 = vpop.f32.mrf.mxu0 }
  0xa3   :  { %v69_v48 = vadd.f32 %v168_v46, %v68_v47 }
  0xa5   :  { %v71_v49 = vmax.f32 %v69_v48, 0.0 }
  0xa7   :  { %110 = vmatmul.f32.vlgmr.msra.gmra.mxu1 %v71_v49 }
 0x124   :  { %v111_v54 = vpop.f32.mrf.mxu1 }
 0x125   :  { %v112_v55 = vadd.f32 %v169_v53, %v111_v54 }
 0x127   :  { %v114_v56 = vmax.f32 %v112_v55, 0.0 }
 0x129   :  { %153 = vmatmul.f32.vlgmr.msra.gmra.mxu2 %v114_v56 }
 0x1ac   :  { %v154_v58 = vpop.f32.mrf.mxu2 }
 0x1ad   :  { %v155_v59 = vadd.f32 %v170_v57, %v154_v58 }
 0x1af   :  { %157 = vst [vmem:[%s241_s3] sm:$0xff] %v155_v59 }
 0x1b0   :  { %162 = vsyncpa [#allocation3], 1 }

</bundles_post_ra>
